<compile_context>
chip_gen: v7x
topology: tpu7x:2x2x1
jax: 0.10.0
libtpu: 0.0.40
codegen_flags: <defaults>
</compile_context>

<pallas_src>
import math

import jax
import jax.numpy as jnp
from jax.experimental import pallas as pl
from jax.experimental.pallas import tpu as pltpu


def _round_up(x, m):
    return (x + m - 1) // m * m


def _vmem_capacity_bytes():
    """Per-core VMEM capacity; conservative (v7x-sized) fallback if unavailable."""
    try:
        cap = getattr(pltpu.get_tpu_info(), "vmem_capacity_bytes", None)
        if cap:
            return int(cap)
    except Exception:
        pass
    return 64 << 20


def _pick_tile_hw(HW, max_lanes, min_tiles):
    """Pick a lane-dense HW tile.

    If HW is a multiple of 128 the tile exactly divides HW (no padding / output slice):
    the largest divisor-of-HW tile that fits the VMEM budget and still leaves at least
    `min_tiles` grid steps. Otherwise (tiny maps) the whole map is one padded tile.
    Returns (tile_hw, hw_pad).
    """
    if HW % 128 == 0:
        q = HW // 128
        best = 1
        for d in range(1, q + 1):
            if q % d == 0 and 128 * d <= max_lanes and (q // d) >= min_tiles:
                best = d
        return 128 * best, HW
    hw_pad = _round_up(HW, 128)
    return hw_pad, hw_pad


def to_rgb_kernel(w_ref, x_ref, bias_ref, out_ref):
    # w_ref:    (1, 3, C_in)   per-batch modulated + pre-scaled 1x1 conv weight
    # x_ref:    (1, C_in, T)   one lane-dense spatial tile of one batch element
    # bias_ref: (3, 1)         output bias (f32)
    # out_ref:  (1, 3, T)
    w = w_ref[0]                                                   # (3, C_in)
    x = x_ref[0]                                                   # (C_in, T)
    out = jnp.dot(w, x, preferred_element_type=jnp.float32)        # 1x1 conv == matmul, f32 acc
    out = out + bias_ref[...]                                      # (3,1) broadcast over lanes
    out_ref[0] = out.astype(out_ref.dtype)


def to_rgb(x_nchw, style, w_mod, b_mod, w_conv, bias):
    """x_nchw: (B, C_in, H, W); style: (B, S).  Returns (B, 3, H, W)."""
    B, C_in, H, W = x_nchw.shape
    S = style.shape[1]
    HW = H * W
    dtype = x_nchw.dtype
    itemsize = jnp.dtype(dtype).itemsize

    # ---- hoisted style modulation (tiny; done once per call in plain XLA) ----
    s = style.astype(jnp.float32) @ (w_mod.astype(jnp.float32) * (1.0 / math.sqrt(S))).T
    s = s + b_mod.reshape(1, C_in).astype(jnp.float32)                        # (B, C_in)
    w_b = (w_conv.astype(jnp.float32) * (1.0 / math.sqrt(C_in)))[None] * s[:, None, :]
    w_b = w_b.astype(dtype)                                                   # (B, 3, C_in)

    # ---- generation-aware tile budget ----
    vmem_cap = _vmem_capacity_bytes()
    if vmem_cap >= (96 << 20):
        # v5e / v6e: 128 MiB VMEM, single TensorCore.
        tile_budget = 44 << 20
        min_tiles = 1
    else:
        # v7x: 64 MiB VMEM, 2 TensorCores per chip -> keep >= 4 total grid steps.
        tile_budget = 22 << 20
        min_tiles = -(-4 // B)

    # Per lane: double-buffered x tile (C_in rows) + out tile (3 rows pad to 8 sublanes).
    per_lane = 2 * (C_in + 8) * itemsize
    max_lanes = max(128, tile_budget // per_lane)

    tile_hw, hw_pad = _pick_tile_hw(HW, max_lanes, min_tiles)
    n_tiles = hw_pad // tile_hw

    # Flatten spatial axis (lane-dense). No channel padding, and when HW % 128 == 0
    # there is no HW padding and no output slice either.
    # TODO(synk): if xprof shows the (H,W)<->(HW) reshape relayouts dominating, switch to a
    # 4-D (1, C_in, th, W)-blocked variant with per-row matmuls when W % 128 == 0.
    x = x_nchw.reshape(B, C_in, HW)
    if hw_pad != HW:                     # only tiny maps (HW % 128 != 0) hit this
        x = jnp.pad(x, ((0, 0), (0, 0), (0, hw_pad - HW)))

    bias2 = bias.reshape(3, 1).astype(jnp.float32)

    # Explicit VMEM budget: double-buffered x + out tiles, weight buffers, slack.
    x_tile_bytes = C_in * tile_hw * itemsize
    out_tile_bytes = 8 * tile_hw * itemsize          # 3 rows pad to 8 sublanes
    w_bytes = 2 * 8 * _round_up(C_in, 128) * itemsize
    vmem_limit = 2 * (x_tile_bytes + out_tile_bytes) + w_bytes + (4 << 20)
    vmem_limit = int(min(max(vmem_limit, 16 << 20), 48 << 20))

    cost = pl.CostEstimate(
        flops=2 * B * 3 * C_in * HW,
        transcendentals=0,
        bytes_accessed=(x.size + B * 3 * hw_pad + w_b.size) * itemsize + bias2.size * 4,
    )

    out = pl.pallas_call(
        to_rgb_kernel,
        out_shape=jax.ShapeDtypeStruct((B, 3, hw_pad), dtype),
        grid_spec=pltpu.PrefetchScalarGridSpec(
            num_scalar_prefetch=0,
            grid=(B, n_tiles),
            in_specs=[
                # Weight/bias block index is constant across the inner axis -> DMAed once
                # per batch element, reused for every HW tile.
                pl.BlockSpec((1, 3, C_in), lambda b, t: (b, 0, 0)),
                pl.BlockSpec((1, C_in, tile_hw), lambda b, t: (b, 0, t)),
                pl.BlockSpec((3, 1), lambda b, t: (0, 0)),
            ],
            out_specs=pl.BlockSpec((1, 3, tile_hw), lambda b, t: (b, 0, t)),
        ),
        compiler_params=pltpu.CompilerParams(
            dimension_semantics=("parallel", "parallel"),
            vmem_limit_bytes=vmem_limit,
        ),
        cost_estimate=cost,
    )(w_b, x, bias2)

    if hw_pad != HW:
        out = out[:, :, :HW]
    return out.reshape(B, 3, H, W)


def to_rgb_reference(x_nchw, style, w_mod, b_mod, w_conv, bias):
    """Pure-JAX reference mirroring the PyTorch forward."""
    B, C_in, H, W = x_nchw.shape
    S = style.shape[1]
    s = style @ (w_mod * (1.0 / math.sqrt(S))).T + b_mod              # (B, C_in)
    w = (1.0 / math.sqrt(C_in)) * w_conv[None] * s[:, None, :]        # (B, 3, C_in)
    x = x_nchw.reshape(B, C_in, H * W)
    out = jnp.einsum("boc,bcp->bop", w, x).reshape(B, 3, H, W)
    return out + bias.reshape(1, 3, 1, 1)


if __name__ == "__main__":
    B, C_in, H, W = 2, 4, 16, 16
    style_dim = 8

    key = jax.random.PRNGKey(0)
    k_x, k_s, k_wm, k_wc = jax.random.split(key, 4)

    x = jax.random.normal(k_x, (B, C_in, H, W), dtype=jnp.float32)
    style = jax.random.normal(k_s, (B, style_dim), dtype=jnp.float32)

    # Parameter shapes matching the PyTorch module:
    #   modulation (EqualLinear): weight (C_in, style_dim) ~ randn, bias init 1
    #   conv weight: (1, 3, C_in, 1, 1) ~ randn  -> (3, C_in)
    #   ToRGB bias:  (1, 3, 1, 1) zeros
    w_mod = jax.random.normal(k_wm, (C_in, style_dim), dtype=jnp.float32)
    b_mod = jnp.ones((C_in,), dtype=jnp.float32)
    w_conv = jax.random.normal(k_wc, (3, C_in), dtype=jnp.float32)
    bias = jnp.zeros((1, 3, 1, 1), dtype=jnp.float32)

    out = to_rgb(x, style, w_mod, b_mod, w_conv, bias)
    out = jax.block_until_ready(out)

    ref = to_rgb_reference(x, style, w_mod, b_mod, w_conv, bias)
    assert out.shape == (B, 3, H, W)
    assert jnp.allclose(out, ref, atol=1e-5, rtol=1e-5), "mismatch vs reference"

    print("KERNEL_OK")
</pallas_src>

<mosaic_0001>
module attributes {stable_mosaic.version = 11 : i64} {
  func.func @to_rgb_kernel(%arg0: i32, %arg1: i32, %arg2: memref<1x3x4xf32, #tpu.memory_space<vmem>>, %arg3: memref<1x4x128xf32, #tpu.memory_space<vmem>>, %arg4: memref<3x1xf32, #tpu.memory_space<vmem>>, %arg5: memref<1x3x128xf32, #tpu.memory_space<vmem>>) attributes {dimension_semantics = [#tpu.dimension_semantics<parallel>, #tpu.dimension_semantics<parallel>], iteration_bounds = array<i64: 2, 2>, scalar_prefetch = 0 : i64, scratch_operands = 0 : i64, tpu.core_type = #tpu.core_type<tc>, window_params = [{transform_indices = @transform_0, window_bounds = array<i64: 1, 3, 4>}, {transform_indices = @transform_1, window_bounds = array<i64: 1, 4, 128>}, {pipeline_mode = #tpu.pipeline_mode<synchronous>, transform_indices = @transform_2, window_bounds = array<i64: 3, 1>}, {transform_indices = @transform_3, window_bounds = array<i64: 1, 3, 128>}]} {
    %c0 = arith.constant 0 : index
    %c0_0 = arith.constant 0 : index
    %c0_1 = arith.constant 0 : index
    %0 = vector.load %arg2[%c0, %c0_0, %c0_1] : memref<1x3x4xf32, #tpu.memory_space<vmem>>, vector<1x3x4xf32>
    %1 = vector.shape_cast %0 : vector<1x3x4xf32> to vector<3x4xf32>
    %c0_2 = arith.constant 0 : index
    %c0_3 = arith.constant 0 : index
    %c0_4 = arith.constant 0 : index
    %2 = vector.load %arg3[%c0_2, %c0_3, %c0_4] : memref<1x4x128xf32, #tpu.memory_space<vmem>>, vector<1x4x128xf32>
    %3 = vector.shape_cast %2 : vector<1x4x128xf32> to vector<4x128xf32>
    %cst = arith.constant dense<0.000000e+00> : vector<3x128xf32>
    %4 = tpu.matmul %1, %3, %cst {dimension_numbers = #tpu.dot_dimension_numbers<[1], [0], [0], [1], [0, 0, 1, 1], [], []>} : vector<3x4xf32>, vector<4x128xf32>, vector<3x128xf32> -> vector<3x128xf32>
    %c0_5 = arith.constant 0 : index
    %c0_6 = arith.constant 0 : index
    %5 = vector.load %arg4[%c0_5, %c0_6] : memref<3x1xf32, #tpu.memory_space<vmem>>, vector<3x1xf32>
    %6 = vector.broadcast %5 : vector<3x1xf32> to vector<3x128xf32>
    %7 = arith.addf %4, %6 : vector<3x128xf32>
    %c0_7 = arith.constant 0 : index
    %c0_8 = arith.constant 0 : index
    %c0_9 = arith.constant 0 : index
    %8 = vector.load %arg5[%c0_7, %c0_8, %c0_9] : memref<1x3x128xf32, #tpu.memory_space<vmem>>, vector<1x3x128xf32>
    %9 = vector.shape_cast %8 : vector<1x3x128xf32> to vector<3x128xf32>
    %10 = vector.shape_cast %7 : vector<3x128xf32> to vector<1x3x128xf32>
    tpu.vector_store %arg5[%c0_7, %c0_8, %c0_9], %10 {strides = array<i32>} : memref<1x3x128xf32, #tpu.memory_space<vmem>>, vector<1x3x128xf32>,
    return
  }
  func.func @transform_0(%arg0: i32, %arg1: i32) -> (i32, i32, i32) {
    %c0_i32 = arith.constant 0 : i32
    %c0_i32_0 = arith.constant 0 : i32
    %c0_i32_1 = arith.constant 0 : i32
    return %arg0, %c0_i32, %c0_i32_0 : i32, i32, i32
  }
  func.func @transform_1(%arg0: i32, %arg1: i32) -> (i32, i32, i32) {
    %c0_i32 = arith.constant 0 : i32
    %c0_i32_0 = arith.constant 0 : i32
    return %arg0, %c0_i32, %arg1 : i32, i32, i32
  }
  func.func @transform_2(%arg0: i32, %arg1: i32) -> (i32, i32) {
    %c0_i32 = arith.constant 0 : i32
    %c0_i32_0 = arith.constant 0 : i32
    %c0_i32_1 = arith.constant 0 : i32
    return %c0_i32, %c0_i32_0 : i32, i32
  }
  func.func @transform_3(%arg0: i32, %arg1: i32) -> (i32, i32, i32) {
    %c0_i32 = arith.constant 0 : i32
    %c0_i32_0 = arith.constant 0 : i32
    return %arg0, %c0_i32, %arg1 : i32, i32, i32
  }
}

</mosaic_0001>

<bundles_post_ra>
// kernel: tpu_custom_call.1
= control target key start
LH: loop header
LB: loop body
LE: loop exit
PB: predicated region body
PF: predicated region fallthrough
CT: control target
= control target key end

     0   :  { %s532_s12 = smov 0   ;;  %s534_s13 = smov 0   ;;  %s589_s0 = inlined_call_operand.vmem [shape: f32[2,3,4], index: 0, kind: input, shape index: {}]   ;;  %s590_s1 = inlined_call_operand.vmem [shape: f32[2,4,256], index: 1, kind: input, shape index: {}]   ;;  %s591_s2 = inlined_call_operand.vmem [shape: f32[3,1], index: 2, kind: input, shape index: {}]   ;;  %s592_s3 = inlined_call_operand.vmem [shape: f32[2,3,256], index: 3, kind: output, shape index: {}]  }
   0x1   :  { %s536_s14 = smov 0   ;;  %s538_s15 = smov 0  }
   0x2   :  { %s540_s16 = smov 0  }
   0x3 LB: > { %s22_s17 = sadd.s32 1, %s499_s14  ;;  %s25_s18 = sadd.s32 1, %s503_s15  ;;  %s507_s16 = sphi %s540_s16, %s13_s16   ;;  %s503_s15 = sphi %s538_s15, %s596_s15   ;;  %s499_s14 = sphi %s536_s14, %s595_s14   ;;  %s495_s13 = sphi %s534_s13, %s594_s13   ;;  %s491_s12 = sphi %s532_s12, %s593_s12  }
   0x4   : > { %p23_p0 = scmp.ge.s32.totalorder %s22_s17, 2  ;;  %p408_p1 = scmp.ge.s32.totalorder %s507_s16, 1 }
   0x5   : > { %p165_p2 = scmp.lt.s32.totalorder %s507_s16, 5 }
   0x6   : > { %s598_s17 = smov (%p23_p0, %s22_s17), 0  ;;  %s600_s18 = smov (!%p23_p0, %s25_s18), %s503_s15 }
   0x7   : > { %p166_p3 = pnand %p408_p1, %p165_p2  ;;  %p27_p4 = scmp.ge.s32.totalorder %s600_s18, 2 }
   0x8   : > { %p199_p5 = scmp.lt.s32.totalorder (!%p166_p3), %s495_s13, 1  ;;  %p205_p6 = scmp.lt.s32.totalorder (!%p166_p3), %s491_s12, 1  ;;  %v509_v0 = vmov (!%p166_p3), 0.0   ;;  %vm510_vm0 = vmmov (!%p166_p3), 0   ;;  %v221_v1 = vld [vmem:[%s591_s2] sm:$0x7] (!%p166_p3) }
   0x9   : > { %s602_s18 = smov (%p27_p4, %s600_s18), 0  ;;  %169 = sbr.rel (%p166_p3) target bundleno = 238 (0xee), region = 32 }
   0xa   : > { %420 = vmatprep.subr.mxu0 (!%p166_p3), %v509_v0  ;;  %422 = vmatprep.mubr.msk.f32.mxu0 (!%p166_p3), %vm510_vm0, %v509_v0  ;;  %v511_v2 = vmov (!%p166_p3), 0   ;;  %vm231_vm1 = vcmask (!%p166_p3), 1043456   ;;  %vm227_vm2 = vcmask (!%p166_p3), 31744  }
   0xb   : > { %468 = vset.pattern.permute.xlu0 (!%p166_p3), %v511_v2 }
   0xc   : > { %224 = vperm.xlu0 (!%p166_p3), %468, %v221_v1  }
  0x10   : > { %s604_s13 = smov (!%p199_p5, %s495_s13), 1  ;;  %s606_s12 = smov (!%p205_p6, %s491_s12), 1 }
  0x11   : > { %s410_s21 = sshll.u32 %s604_s13, 1  ;;  %s409_s22 = sshll.u32 %s604_s13, 2 }
  0x12   : > { %s208_s23 = sadd.s32 %s410_s21, %s606_s12  ;;  %s202_s26 = scalar_lea.vmem %s589_s0, %s409_s22 }
  0x13   : > { %s411_s27 = sshll.u32 %s208_s23, 2  ;;  %v219_v3 = vld [vmem:[%s202_s26] sm:$0x7] }
  0x14   : > { %s210_s30 = scalar_lea.vmem %s590_s1, %s411_s27  ;;  %s218_s6 = scalar_lea.vmem %s592_s3, %s411_s27 }
  0x15   : > { %v220_v4 = vld [vmem:[%s210_s30] sm:$0xf] }
  0x16   : > { %421 = vmatpush3.msk.msra.mxu0 %vm231_vm1, %v220_v4 }
  0x17   : > { %423 = vmatmul.mubr.msk.f32.vlgmr.msra.gmra.mrb[0].mxu0 %vm227_vm2, %v219_v3 }
  0x8b   : > { %v225_v5 = vpop.permute.xlu0 %224 }
  0xea   : > { %v301_v6 = vpop.f32.mrb[0].mxu0 }
  0xeb   : > { %v302_v7 = vadd.f32 %v301_v6, %v225_v5  ;;  %v424_v8 = vpop.f32.mrb[1].mxu0 }
  0xed   : > { %305 = vst [vmem:[%s218_s6] sm:$0x7] %v302_v7 }
  0xee PF: > { %s13_s16 = sadd.s32 1, %s507_s16   ;;  %s593_s12 = smov %s499_s14 }
  0xef   : > { %p10_p7 = scmp.ge.s32.totalorder %s13_s16, 6   ;;  %s594_s13 = smov %s503_s15 }
  0xf0   : > { %s595_s14 = smov %s598_s17  ;;  %s596_s15 = smov %s602_s18 }
  0xf1   :  { %12 = sbr.rel (!%p10_p7) target bundleno = 3 (0x3), region = 65 }

</bundles_post_ra>
